<compile_context>
chip_gen: v6e
topology: v6e:2x2x1
jax: 0.10.0
libtpu: 0.0.40
codegen_flags: <defaults>
</compile_context>

<pallas_src>
import functools

import jax
import jax.numpy as jnp
from jax.experimental import pallas as pl
from jax.experimental.pallas import tpu as pltpu

LANE_TILE = 128  # batch tile mapped to lanes


def value_net_kernel(s_ref, w1_ref, b1_ref, w2_ref, b2_ref, o_ref):
    # s_ref : (S, TB)   state tile, batch in lanes
    # w1_ref: (H, S)    linear1.weight (VMEM-resident)
    # b1_ref: (H, 1)    linear1.bias   (VMEM-resident)
    # w2_ref: (H, 1)    linear4.weight^T (VMEM-resident)
    # b2_ref: (1, 1)    linear4.bias   (SMEM scalar)
    # o_ref : (1, TB)   value tile, batch in lanes (lane-dense store)
    s_bf = s_ref[...].astype(jnp.bfloat16)
    w1_bf = w1_ref[...].astype(jnp.bfloat16)
    # hidden = relu(W1 @ state + b1), f32 accumulation on the MXU
    h = jnp.dot(w1_bf, s_bf, preferred_element_type=jnp.float32)       # (H, TB)
    h = jnp.maximum(h + b1_ref[...], 0.0)                              # f32 bias + ReLU
    # Degenerate N=1 second layer -> VPU multiply + cross-sublane (XLU) reduce.
    v = jnp.sum(h * w2_ref[...], axis=0, keepdims=True)                # (1, TB)
    o_ref[...] = (v + b2_ref[0, 0]).astype(o_ref.dtype)


@functools.partial(jax.jit, static_argnames=("block_b",))
def value_network_forward(state, w1, b1, w2, b2, *, block_b=LANE_TILE):
    """state: (B, S) f32; w1: (H, S); b1: (H,); w2: (1, H); b2: (1,)  ->  (B, 1) f32.

    Parameters use the PyTorch nn.Linear layout (weight = (out, in))."""
    B, S = state.shape
    H = w1.shape[0]
    n_blocks = pl.cdiv(B, block_b)
    B_pad = n_blocks * block_b

    # Batch-in-lanes layout: pad batch to a multiple of the lane tile, transpose.
    state_t = jnp.pad(state, ((0, B_pad - B), (0, 0))).T    # (S, B_pad)
    b1_c = b1.reshape(H, 1)
    w2_c = w2.reshape(H, 1)                                  # linear4.weight^T
    b2_c = b2.reshape(1, 1)

    out_t = pl.pallas_call(
        value_net_kernel,
        out_shape=jax.ShapeDtypeStruct((1, B_pad), jnp.float32),
        grid=(n_blocks,),
        in_specs=[
            pl.BlockSpec((S, block_b), lambda i: (0, i)),          # state tile (streamed)
            pl.BlockSpec((H, S), lambda i: (0, 0)),                # W1 resident
            pl.BlockSpec((H, 1), lambda i: (0, 0)),                # b1 resident
            pl.BlockSpec((H, 1), lambda i: (0, 0)),                # W2^T resident
            pl.BlockSpec(memory_space=pltpu.MemorySpace.SMEM),     # b2 scalar
        ],
        out_specs=pl.BlockSpec((1, block_b), lambda i: (0, i)),
        compiler_params=pltpu.CompilerParams(
            # batch axis is independent -> shards across TensorCores on v7x
            dimension_semantics=("parallel",),
        ),
    )(state_t, w1, b1_c, w2_c, b2_c)

    # Drop batch padding, return PyTorch-shaped (B, 1) values.
    return out_t[:, :B].T


if __name__ == "__main__":
    key = jax.random.PRNGKey(0)
    k_state, k1, k2, k3, k4 = jax.random.split(key, 5)

    # cartpole: state_dim=4, hidden=32; batch intentionally non-multiple of 128
    # to exercise padding + a multi-step batch grid.
    B, STATE_DIM, HIDDEN_DIM = 500, 4, 32

    # PyTorch-style nn.Linear params: weight (out, in), bias (out,)
    bound1 = 1.0 / jnp.sqrt(STATE_DIM)
    bound2 = 1.0 / jnp.sqrt(HIDDEN_DIM)
    w1 = jax.random.uniform(k1, (HIDDEN_DIM, STATE_DIM), jnp.float32, -bound1, bound1)
    b1 = jax.random.uniform(k2, (HIDDEN_DIM,), jnp.float32, -bound1, bound1)
    w2 = jax.random.uniform(k3, (1, HIDDEN_DIM), jnp.float32, -bound2, bound2)
    b2 = jax.random.uniform(k4, (1,), jnp.float32, -bound2, bound2)
    state = jax.random.normal(k_state, (B, STATE_DIM), jnp.float32)

    out = value_network_forward(state, w1, b1, w2, b2)
    out = jax.block_until_ready(out)
    assert out.shape == (B, 1)

    # Reference matching the kernel's numerics (bf16 first matmul, f32 accumulation).
    h_ref = jnp.dot(state.astype(jnp.bfloat16), w1.T.astype(jnp.bfloat16),
                    preferred_element_type=jnp.float32) + b1[None, :]
    h_ref = jnp.maximum(h_ref, 0.0)
    ref = h_ref @ w2.T + b2[None, :]
    assert jnp.allclose(out, ref, atol=1e-3, rtol=1e-3)

    # Looser sanity check against the pure-f32 PyTorch semantics.
    h_f32 = jnp.maximum(state @ w1.T + b1[None, :], 0.0)
    ref_f32 = h_f32 @ w2.T + b2[None, :]
    assert jnp.allclose(out, ref_f32, atol=5e-2, rtol=5e-2)

    print("KERNEL_OK")
</pallas_src>

<mosaic_0001>
module attributes {stable_mosaic.version = 11 : i64} {
  func.func @value_net_kernel(%arg0: i32, %arg1: memref<4x128xf32, #tpu.memory_space<vmem>>, %arg2: memref<32x4xf32, #tpu.memory_space<vmem>>, %arg3: memref<32x1xf32, #tpu.memory_space<vmem>>, %arg4: memref<32x1xf32, #tpu.memory_space<vmem>>, %arg5: memref<1x1xf32, #tpu.memory_space<smem>>, %arg6: memref<1x128xf32, #tpu.memory_space<vmem>>) attributes {dimension_semantics = [#tpu.dimension_semantics<parallel>], iteration_bounds = array<i64: 4>, scalar_prefetch = 0 : i64, scratch_operands = 0 : i64, tpu.core_type = #tpu.core_type<tc>, window_params = [{transform_indices = @transform_0, window_bounds = array<i64: 4, 128>}, {pipeline_mode = #tpu.pipeline_mode<synchronous>, transform_indices = @transform_1, window_bounds = array<i64: 32, 4>}, {pipeline_mode = #tpu.pipeline_mode<synchronous>, transform_indices = @transform_2, window_bounds = array<i64: 32, 1>}, {pipeline_mode = #tpu.pipeline_mode<synchronous>, transform_indices = @transform_3, window_bounds = array<i64: 32, 1>}, {transform_indices = @transform_4, window_bounds = array<i64: 1, 1>}, {transform_indices = @transform_5, window_bounds = array<i64: 1, 128>}]} {
    %c0 = arith.constant 0 : index
    %c0_0 = arith.constant 0 : index
    %0 = vector.load %arg1[%c0, %c0_0] : memref<4x128xf32, #tpu.memory_space<vmem>>, vector<4x128xf32>
    %1 = arith.truncf %0 : vector<4x128xf32> to vector<4x128xbf16>
    %c0_1 = arith.constant 0 : index
    %c0_2 = arith.constant 0 : index
    %2 = vector.load %arg2[%c0_1, %c0_2] : memref<32x4xf32, #tpu.memory_space<vmem>>, vector<32x4xf32>
    %3 = arith.truncf %2 : vector<32x4xf32> to vector<32x4xbf16>
    %cst = arith.constant dense<0.000000e+00> : vector<32x128xf32>
    %4 = tpu.matmul %3, %1, %cst {dimension_numbers = #tpu.dot_dimension_numbers<[1], [0], [0], [1], [0, 0, 1, 1], [], []>} : vector<32x4xbf16>, vector<4x128xbf16>, vector<32x128xf32> -> vector<32x128xf32>
    %c0_3 = arith.constant 0 : index
    %c0_4 = arith.constant 0 : index
    %5 = vector.load %arg3[%c0_3, %c0_4] : memref<32x1xf32, #tpu.memory_space<vmem>>, vector<32x1xf32>
    %6 = vector.broadcast %5 : vector<32x1xf32> to vector<32x128xf32>
    %7 = arith.addf %4, %6 : vector<32x128xf32>
    %cst_5 = arith.constant 0.000000e+00 : f32
    %8 = vector.broadcast %cst_5 : f32 to vector<32x128xf32>
    %9 = arith.maximumf %7, %8 : vector<32x128xf32>
    %c0_6 = arith.constant 0 : index
    %c0_7 = arith.constant 0 : index
    %10 = vector.load %arg4[%c0_6, %c0_7] : memref<32x1xf32, #tpu.memory_space<vmem>>, vector<32x1xf32>
    %11 = vector.broadcast %10 : vector<32x1xf32> to vector<32x128xf32>
    %12 = arith.mulf %9, %11 : vector<32x128xf32>
    %cst_8 = arith.constant dense<0.000000e+00> : vector<128xf32>
    %13 = vector.multi_reduction <add>, %12, %cst_8 [0] : vector<32x128xf32> to vector<128xf32>
    %14 = vector.shape_cast %13 : vector<128xf32> to vector<1x128xf32>
    %c0_9 = arith.constant 0 : index
    %c0_10 = arith.constant 0 : index
    %15 = memref.load %arg5[%c0_9, %c0_10] : memref<1x1xf32, #tpu.memory_space<smem>>
    %16 = vector.broadcast %15 : f32 to vector<1x128xf32>
    %17 = arith.addf %14, %16 : vector<1x128xf32>
    %c0_11 = arith.constant 0 : index
    %c0_12 = arith.constant 0 : index
    %18 = vector.load %arg6[%c0_11, %c0_12] : memref<1x128xf32, #tpu.memory_space<vmem>>, vector<1x128xf32>
    tpu.vector_store %arg6[%c0_11, %c0_12], %17 {strides = array<i32>} : memref<1x128xf32, #tpu.memory_space<vmem>>, vector<1x128xf32>,
    return
  }
  func.func @transform_0(%arg0: i32) -> (i32, i32) {
    %c0_i32 = arith.constant 0 : i32
    %c0_i32_0 = arith.constant 0 : i32
    return %c0_i32, %arg0 : i32, i32
  }
  func.func @transform_1(%arg0: i32) -> (i32, i32) {
    %c0_i32 = arith.constant 0 : i32
    %c0_i32_0 = arith.constant 0 : i32
    %c0_i32_1 = arith.constant 0 : i32
    return %c0_i32, %c0_i32_0 : i32, i32
  }
  func.func @transform_2(%arg0: i32) -> (i32, i32) {
    %c0_i32 = arith.constant 0 : i32
    %c0_i32_0 = arith.constant 0 : i32
    %c0_i32_1 = arith.constant 0 : i32
    return %c0_i32, %c0_i32_0 : i32, i32
  }
  func.func @transform_3(%arg0: i32) -> (i32, i32) {
    %c0_i32 = arith.constant 0 : i32
    %c0_i32_0 = arith.constant 0 : i32
    %c0_i32_1 = arith.constant 0 : i32
    return %c0_i32, %c0_i32_0 : i32, i32
  }
  func.func @transform_4(%arg0: i32) -> (i32, i32) {
    %c0_i32 = arith.constant 0 : i32
    %c0_i32_0 = arith.constant 0 : i32
    %c0_i32_1 = arith.constant 0 : i32
    return %c0_i32, %c0_i32_0 : i32, i32
  }
  func.func @transform_5(%arg0: i32) -> (i32, i32) {
    %c0_i32 = arith.constant 0 : i32
    %c0_i32_0 = arith.constant 0 : i32
    return %c0_i32, %arg0 : i32, i32
  }
}

</mosaic_0001>

<bundles_post_ra>
// kernel: value_network_forward.1
= control target key start
LH: loop header
LB: loop body
LE: loop exit
PB: predicated region body
PF: predicated region fallthrough
CT: control target
= control target key end

     0   :  { %s477_s20 = smov 0   ;;  %s536_s0 = inlined_call_operand.vmem [shape: f32[4,512], index: 0, kind: input, shape index: {}]   ;;  %s537_s1 = inlined_call_operand.vmem [shape: f32[32,4], index: 1, kind: input, shape index: {}]   ;;  %s538_s2 = inlined_call_operand.vmem [shape: f32[32,1], index: 2, kind: input, shape index: {}]   ;;  %s539_s3 = inlined_call_operand.vmem [shape: f32[32,1], index: 3, kind: input, shape index: {}]   ;;  %s540_s4 = inlined_call_operand.<no memory space> [shape: f32[1,1], index: 4, kind: input, shape index: {}]   ;;  %s541_s5 = inlined_call_operand.vmem [shape: f32[1,512], index: 5, kind: output, shape index: {}]  }
   0x1   :  { %10 = sst [smem:[#allocation2]] %s540_s4 }
   0x2 LB: > { %s404_s21 = sadd.s32 4294967295, %s441_s20   ;;  %p408_p0 = scmp.ge.s32.totalorder %s441_s20, 1  ;;  %s441_s20 = sphi %s477_s20, %s16_s20  }
   0x3   : > { %p187_p1 = scmp.lt.s32.totalorder %s441_s20, 5 }
   0x5   : > { %p188_p2 = pnand %p408_p0, %p187_p1 }
   0x6   : > { %p212_p3 = scmp.lt.s32.totalorder (!%p188_p2), %s404_s21, 3  ;;  %s353_s25 = sld [smem:[#allocation2]] (!%p188_p2) }
   0x7   : > { %191 = sbr.rel (%p188_p2) target bundleno = 249 (0xf9), region = 40 }
   0xc   : > { %v222_v0 = vld [vmem:[%s537_s1] sm:$0xff]  ;;  %v223_v1 = vld [vmem:[%s537_s1 + $0x8] sm:$0xff]  ;;  %vm252_vm0 = vcmask 31744   ;;  %v230_v4 = vld [vmem:[%s538_s2 + $0x10] sm:$0xff]  ;;  %s543_s21 = smov (!%p212_p3, %s404_s21), 3  ;;  %v443_v5 = vmov 0   ;;  %v354_v50 = vstv %s353_s25 }
   0xd   : > { %v226_v2 = vpack.c.bf16 %v223_v1, %v222_v0  ;;  %v228_v3 = vld [vmem:[%s538_s2] sm:$0xff]  ;;  %433 = vset.pattern.permute.xlu0 %v443_v5  ;;  %434 = vset.pattern.permute.xlu1 %v443_v5  ;;  %s409_s29 = sshll.u32 %s543_s21, 2  ;;  %v229_v6 = vld [vmem:[%s538_s2 + $0x8] sm:$0xff]  ;;  %v231_v7 = vld [vmem:[%s538_s2 + $0x18] sm:$0xff]  ;;  %vm259_vm1 = vcmask 1041408   ;;  %s218_s28 = scalar_lea.vmem %s541_s5, %s543_s21 }
   0xe   : > { %234 = vperm.xlu0 %433, %v228_v3   ;;  %244 = vperm.xlu1 %434, %v230_v4   ;;  %s215_s9 = scalar_lea.vmem %s536_s0, %s409_s29  ;;  %v224_v9 = vld [vmem:[%s537_s1 + $0x10] sm:$0xff]  ;;  %v225_v10 = vld [vmem:[%s537_s1 + $0x18] sm:$0xff]  ;;  %v316_v12 = vld [vmem:[%s539_s3] sm:$0xff] }
   0xf   : > { %419 = vmatprep.mubr.msk.bf16.mxu0 %vm252_vm0, %v226_v2  ;;  %v220_v8 = vld [vmem:[%s215_s9] sm:$0xf]  ;;  %v227_v14 = vpack.c.bf16 %v225_v10, %v224_v9  ;;  %v317_v15 = vld [vmem:[%s539_s3 + $0x8] sm:$0xff]  ;;  %v318_v16 = vld [vmem:[%s539_s3 + $0x10] sm:$0xff] }
  0x10   : > { %v221_v11 = vpack.c.bf16 %v220_v8, %v220_v8  ;;  %v319_v17 = vld [vmem:[%s539_s3 + $0x18] sm:$0xff] }
  0x12   : > { %239 = vperm.xlu0 %433, %v229_v6   ;;  %249 = vperm.xlu1 %434, %v231_v7   ;;  %v261_v13 = vsel %vm259_vm1, %v221_v11, 0 }
  0x13   : > { %423 = vmatprep.subr.msk.bf16.mxu0 %vm259_vm1, %v221_v11 }
  0x14   : > { %418 = vmatpush3.bf16.msra.mxu0 %v261_v13 }
  0x16   : > { %322 = vperm.xlu0 %433, %v316_v12   ;;  %327 = vperm.xlu1 %434, %v317_v15  }
  0x17   : > { %420 = vmatmul.mubr.msk.bf16.vlgmr.msra.gmra.mxu0 %vm252_vm0, %v227_v14 }
  0x1a   : > { %332 = vperm.xlu0 %433, %v318_v16   ;;  %337 = vperm.xlu1 %434, %v319_v17  }
  0x89   : > { %v235_v18 = vpop.permute.xlu0 %234  ;;  %v245_v19 = vpop.permute.xlu1 %244 }
  0x8d   : > { %v240_v20 = vpop.permute.xlu0 %239  ;;  %v250_v22 = vpop.permute.xlu1 %249 }
  0x91   : > { %v323_v27 = vpop.permute.xlu0 %322  ;;  %v328_v32 = vpop.permute.xlu1 %327 }
  0x95   : > { %v333_v38 = vpop.permute.xlu0 %332  ;;  %v338_v41 = vpop.permute.xlu1 %337 }
  0xd7   : > { %v421_v21 = vpop.f32.mrf.mxu0 }
  0xd8   : > { %v306_v26 = vadd.f32 %v421_v21, %v245_v19 }
  0xd9   : > { %v297_v23 = vpop.f32.mrf.mxu0 }
  0xda   : > { %v298_v24 = vadd.f32 %v297_v23, %v235_v18  ;;  %v314_v33 = vmax.f32 %v306_v26, 0.0 }
  0xdb   : > { %v422_v25 = vpop.f32.mrf.mxu0 }
  0xdc   : > { %v312_v29 = vmax.f32 %v298_v24, 0.0  ;;  %v309_v30 = vadd.f32 %v422_v25, %v250_v22  ;;  %v342_v39 = vmul.f32 %v333_v38, %v314_v33 }
  0xdd   : > { %v300_v28 = vpop.f32.mrf.mxu0 }
  0xde   : > { %v301_v31 = vadd.f32 %v300_v28, %v240_v20  ;;  %v340_v35 = vmul.f32 %v323_v27, %v312_v29  ;;  %v315_v36 = vmax.f32 %v309_v30, 0.0 }
  0xe0   : > { %v313_v34 = vmax.f32 %v301_v31, 0.0  ;;  %v343_v42 = vmul.f32 %v338_v41, %v315_v36 }
  0xe2   : > { %v341_v37 = vmul.f32 %v328_v32, %v313_v34 }
  0xe4   : > { %v344_v40 = vadd.f32 %v341_v37, %v340_v35 }
  0xe6   : > { %v345_v43 = vadd.f32 %v344_v40, %v342_v39 }
  0xe8   : > { %v346_v44 = vadd.f32 %v345_v43, %v343_v42 }
  0xea   : > { %v347_v45 = vrot.slane %v346_v44, 4 }
  0xec   : > { %v348_v46 = vadd.f32 %v347_v45, %v346_v44 }
  0xee   : > { %v349_v47 = vrot.slane %v348_v46, 2 }
  0xf0   : > { %v350_v48 = vadd.f32 %v349_v47, %v348_v46 }
  0xf2   : > { %v351_v49 = vrot.slane %v350_v48, 1 }
  0xf4   : > { %v352_v51 = vadd.f32 %v351_v49, %v350_v48 }
  0xf6   : > { %v355_v52 = vadd.f32 %v354_v50, %v352_v51 }
  0xf8   : > { %356 = vst [vmem:[%s218_s28] sm:$0x1] %v355_v52 }
  0xf9 PF: > { %s16_s20 = sadd.s32 1, %s441_s20  }
  0xfa   : > { %p13_p4 = scmp.ge.s32.totalorder %s16_s20, 6  }
  0xfc   :  { %15 = sbr.rel (!%p13_p4) target bundleno = 2 (0x2), region = 70 }

</bundles_post_ra>
